<compile_context>
chip_gen: v7x
topology: tpu7x:2x2x1
jax: 0.10.0
libtpu: 0.0.40
codegen_flags: <defaults>
</compile_context>

<pallas_src>
import functools

import jax
import jax.numpy as jnp
from jax.experimental import pallas as pl
from jax.experimental.pallas import tpu as pltpu


def _round_up(x, m):
    return ((x + m - 1) // m) * m


def _contrastive_loss_kernel(margin_ref, e1_ref, e2_ref, label_ref, out_ref,
                             acc_ref, *, batch, block_rows):
    """One grid step over a (block_rows, D) batch tile.

    margin_ref : (1, 1)  SMEM f32  (whole array, resident)
    e1_ref     : (TB, D) VMEM      (pipelined tile)
    e2_ref     : (TB, D) VMEM      (pipelined tile)
    label_ref  : (TB, 1) VMEM f32  (pipelined tile)
    out_ref    : (1, 1)  SMEM f32  (scalar result, written only at last step)
    acc_ref    : (TB, 1) VMEM f32  scratch accumulator (persists across steps)
    """
    i = pl.program_id(0)
    nsteps = pl.num_programs(0)

    @pl.when(i == 0)
    def _init():
        acc_ref[...] = jnp.zeros_like(acc_ref)

    # Upcast inside the kernel: keeps HBM traffic narrow if inputs are bf16.
    diff = e1_ref[...].astype(jnp.float32) - e2_ref[...].astype(jnp.float32)
    sq_dist = jnp.sum(diff * diff, axis=1, keepdims=True)        # (TB, 1) = dist^2
    dist = jnp.sqrt(sq_dist)                                      # EUP, hidden under DMA

    label = label_ref[...]                                        # (TB, 1), already f32
    margin = margin_ref[0, 0]
    hinge = jnp.maximum(margin - dist, 0.0)
    per_row = label * sq_dist + (1.0 - label) * hinge * hinge     # (TB, 1)

    # Mask tail rows of the final (partial) tile so OOB-padded garbage rows
    # cannot pollute the accumulated sum.  Emitted only when actually needed.
    if batch % block_rows != 0:
        row = jax.lax.broadcasted_iota(jnp.int32, per_row.shape, 0) + i * block_rows
        per_row = jnp.where(row < batch, per_row, 0.0)

    acc_ref[...] += per_row                                       # stays in vregs/VMEM

    @pl.when(i == nsteps - 1)
    def _finalize():
        # Single scalar write for the whole kernel (mean = sum / B).
        out_ref[0, 0] = jnp.sum(acc_ref[...]) * (1.0 / batch)


def contrastive_loss(embed1, embed2, label, margin: float = 1.0,
                     block_rows=None):
    """embed1, embed2: (B, D); label: (B,). Returns scalar float32 loss."""
    B, D = embed1.shape
    itemsize = jnp.dtype(embed1.dtype).itemsize

    # Batch tile: target ~2 MiB per (TB, D) embedding block, rounded to a
    # multiple of 8 sublanes, capped at the (padded) batch size.
    if block_rows is None:
        target_block_bytes = 2 * 1024 * 1024
        tb = (target_block_bytes // max(1, D * itemsize)) // 8 * 8
        tb = max(8, min(int(tb), _round_up(B, 8)))
    else:
        tb = max(8, _round_up(int(block_rows), 8))
    num_tiles = pl.cdiv(B, tb)

    # VMEM budget: 2 embedding streams x double buffer + label stream (double
    # buffered) + scratch accumulator + headroom.
    block_bytes = tb * D * itemsize
    vmem_needed = 2 * 2 * block_bytes + 2 * tb * 4 + tb * 4 + (2 << 20)
    vmem_limit = int(min(64 << 20, max(8 << 20, vmem_needed)))

    label_2d = label.reshape(B, 1).astype(jnp.float32)       # single cast, wrapper only
    margin_arr = jnp.full((1, 1), margin, dtype=jnp.float32)

    kernel = functools.partial(_contrastive_loss_kernel, batch=B, block_rows=tb)

    out = pl.pallas_call(
        kernel,
        out_shape=jax.ShapeDtypeStruct((1, 1), jnp.float32),
        grid=(num_tiles,),
        in_specs=[
            pl.BlockSpec(memory_space=pltpu.SMEM),             # margin scalar
            pl.BlockSpec((tb, D), lambda i: (i, 0)),            # embed1 tile
            pl.BlockSpec((tb, D), lambda i: (i, 0)),            # embed2 tile
            pl.BlockSpec((tb, 1), lambda i: (i, 0)),            # label tile
        ],
        out_specs=pl.BlockSpec(memory_space=pltpu.SMEM),        # (1,1) scalar result
        scratch_shapes=[pltpu.VMEM((tb, 1), jnp.float32)],      # running per-row sums
        compiler_params=pltpu.CompilerParams(
            dimension_semantics=("arbitrary",),                 # reduction axis
            vmem_limit_bytes=vmem_limit,
        ),
    )(margin_arr, embed1, embed2, label_2d)
    return out[0, 0]


def _reference(embed1, embed2, label, margin=1.0):
    diff = embed1.astype(jnp.float32) - embed2.astype(jnp.float32)
    dist = jnp.sqrt(jnp.sum(diff * diff, axis=1))
    loss_pos = label * dist ** 2
    loss_neg = (1.0 - label) * jnp.maximum(margin - dist, 0.0) ** 2
    return jnp.mean(loss_pos + loss_neg)


if __name__ == "__main__":
    key = jax.random.PRNGKey(0)
    k1, k2, k3, k4, k5, k6, k7, k8, k9 = jax.random.split(key, 9)

    # Case 1: explicit small tile -> multi-step reduction grid + ragged tail tile.
    B, D = 20, 32
    e1 = jax.random.normal(k1, (B, D), dtype=jnp.float32)
    e2 = jax.random.normal(k2, (B, D), dtype=jnp.float32)
    lab = jax.random.bernoulli(k3, 0.5, (B,)).astype(jnp.float32)
    loss = jax.block_until_ready(
        contrastive_loss(e1, e2, lab, margin=1.0, block_rows=8))
    ref = _reference(e1, e2, lab, margin=1.0)
    assert jnp.allclose(loss, ref, atol=1e-5, rtol=1e-5), (loss, ref)

    # Case 2: auto tile sizing, non-default margin, different feature width.
    B2, D2 = 137, 64
    e1b = jax.random.normal(k4, (B2, D2), dtype=jnp.float32)
    e2b = jax.random.normal(k5, (B2, D2), dtype=jnp.float32)
    labb = jax.random.bernoulli(k6, 0.5, (B2,)).astype(jnp.float32)
    loss2 = jax.block_until_ready(contrastive_loss(e1b, e2b, labb, margin=0.75))
    ref2 = _reference(e1b, e2b, labb, margin=0.75)
    assert jnp.allclose(loss2, ref2, atol=1e-5, rtol=1e-5), (loss2, ref2)

    # Case 3: bf16 embeddings stay bf16 on the DMA path, upcast in-kernel.
    B3, D3 = 48, 128
    e1c = jax.random.normal(k7, (B3, D3), dtype=jnp.bfloat16)
    e2c = jax.random.normal(k8, (B3, D3), dtype=jnp.bfloat16)
    labc = jax.random.bernoulli(k9, 0.5, (B3,)).astype(jnp.float32)
    loss3 = jax.block_until_ready(
        contrastive_loss(e1c, e2c, labc, margin=1.0, block_rows=16))
    ref3 = _reference(e1c, e2c, labc, margin=1.0)
    assert jnp.allclose(loss3, ref3, atol=1e-4, rtol=1e-4), (loss3, ref3)

    print("KERNEL_OK")
</pallas_src>

<mosaic_0001>
module attributes {stable_mosaic.version = 11 : i64} {
  func.func @_contrastive_loss_kernel(%arg0: i32, %arg1: memref<1x1xf32, #tpu.memory_space<smem>>, %arg2: memref<8x32xf32, #tpu.memory_space<vmem>>, %arg3: memref<8x32xf32, #tpu.memory_space<vmem>>, %arg4: memref<8x1xf32, #tpu.memory_space<vmem>>, %arg5: memref<1x1xf32, #tpu.memory_space<smem>>, %arg6: memref<8x1xf32, #tpu.memory_space<vmem>>) attributes {dimension_semantics = [#tpu.dimension_semantics<arbitrary>], iteration_bounds = array<i64: 3>, scalar_prefetch = 0 : i64, scratch_operands = 1 : i64, tpu.core_type = #tpu.core_type<tc>, window_params = [{transform_indices = @transform_0, window_bounds = array<i64: 1, 1>}, {transform_indices = @transform_1, window_bounds = array<i64: 8, 32>}, {transform_indices = @transform_2, window_bounds = array<i64: 8, 32>}, {transform_indices = @transform_3, window_bounds = array<i64: 8, 1>}, {transform_indices = @transform_4, window_bounds = array<i64: 1, 1>}]} {
    %c0_i32 = arith.constant 0 : i32
    %0 = arith.cmpi eq, %arg0, %c0_i32 : i32
    %1 = arith.extui %0 : i1 to i32
    %c0_i32_0 = arith.constant 0 : i32
    %2 = arith.cmpi ne, %1, %c0_i32_0 : i32
    scf.if %2 {
      %cst_16 = arith.constant 0.000000e+00 : f32
      %36 = vector.broadcast %cst_16 : f32 to vector<8x1xf32>
      %c0_17 = arith.constant 0 : index
      %c0_18 = arith.constant 0 : index
      %37 = vector.load %arg6[%c0_17, %c0_18] : memref<8x1xf32, #tpu.memory_space<vmem>>, vector<8x1xf32>
      tpu.vector_store %arg6[%c0_17, %c0_18], %36 {strides = array<i32>} : memref<8x1xf32, #tpu.memory_space<vmem>>, vector<8x1xf32>,
    } else {
    }
    %c0 = arith.constant 0 : index
    %c0_1 = arith.constant 0 : index
    %3 = vector.load %arg2[%c0, %c0_1] : memref<8x32xf32, #tpu.memory_space<vmem>>, vector<8x32xf32>
    %c0_2 = arith.constant 0 : index
    %c0_3 = arith.constant 0 : index
    %4 = vector.load %arg3[%c0_2, %c0_3] : memref<8x32xf32, #tpu.memory_space<vmem>>, vector<8x32xf32>
    %5 = arith.subf %3, %4 : vector<8x32xf32>
    %6 = arith.mulf %5, %5 : vector<8x32xf32>
    %cst = arith.constant dense<0.000000e+00> : vector<8xf32>
    %7 = vector.multi_reduction <add>, %6, %cst [1] : vector<8x32xf32> to vector<8xf32>
    %8 = vector.shape_cast %7 : vector<8xf32> to vector<8x1xf32>
    %9 = math.sqrt %8 : vector<8x1xf32>
    %c0_4 = arith.constant 0 : index
    %c0_5 = arith.constant 0 : index
    %10 = vector.load %arg4[%c0_4, %c0_5] : memref<8x1xf32, #tpu.memory_space<vmem>>, vector<8x1xf32>
    %c0_6 = arith.constant 0 : index
    %c0_7 = arith.constant 0 : index
    %11 = memref.load %arg1[%c0_6, %c0_7] : memref<1x1xf32, #tpu.memory_space<smem>>
    %12 = vector.broadcast %11 : f32 to vector<8x1xf32>
    %13 = arith.subf %12, %9 : vector<8x1xf32>
    %cst_8 = arith.constant 0.000000e+00 : f32
    %14 = vector.broadcast %cst_8 : f32 to vector<8x1xf32>
    %15 = arith.maximumf %13, %14 : vector<8x1xf32>
    %16 = arith.mulf %10, %8 : vector<8x1xf32>
    %cst_9 = arith.constant 1.000000e+00 : f32
    %17 = vector.broadcast %cst_9 : f32 to vector<8x1xf32>
    %18 = arith.subf %17, %10 : vector<8x1xf32>
    %19 = arith.mulf %18, %15 : vector<8x1xf32>
    %20 = arith.mulf %19, %15 : vector<8x1xf32>
    %21 = arith.addf %16, %20 : vector<8x1xf32>
    %22 = tpu.iota {dimensions = array<i32: 0>} : vector<8x1xi32>
    %c8_i32 = arith.constant 8 : i32
    %23 = arith.muli %arg0, %c8_i32 : i32
    %24 = vector.broadcast %23 : i32 to vector<8x1xi32>
    %25 = arith.addi %22, %24 : vector<8x1xi32>
    %c20_i32 = arith.constant 20 : i32
    %26 = vector.broadcast %c20_i32 : i32 to vector<8x1xi32>
    %27 = arith.cmpi slt, %25, %26 : vector<8x1xi32>
    %cst_10 = arith.constant 0.000000e+00 : f32
    %28 = vector.broadcast %cst_10 : f32 to vector<8x1xf32>
    %29 = arith.select %27, %21, %28 : vector<8x1xi1>, vector<8x1xf32>
    %c0_11 = arith.constant 0 : index
    %c0_12 = arith.constant 0 : index
    %30 = vector.load %arg6[%c0_11, %c0_12] : memref<8x1xf32, #tpu.memory_space<vmem>>, vector<8x1xf32>
    %31 = arith.addf %30, %29 : vector<8x1xf32>
    %c0_13 = arith.constant 0 : index
    %c0_14 = arith.constant 0 : index
    %32 = vector.load %arg6[%c0_13, %c0_14] : memref<8x1xf32, #tpu.memory_space<vmem>>, vector<8x1xf32>
    tpu.vector_store %arg6[%c0_13, %c0_14], %31 {strides = array<i32>} : memref<8x1xf32, #tpu.memory_space<vmem>>, vector<8x1xf32>,
    %c2_i32 = arith.constant 2 : i32
    %33 = arith.cmpi eq, %arg0, %c2_i32 : i32
    %34 = arith.extui %33 : i1 to i32
    %c0_i32_15 = arith.constant 0 : i32
    %35 = arith.cmpi ne, %34, %c0_i32_15 : i32
    scf.if %35 {
      %c0_16 = arith.constant 0 : index
      %c0_17 = arith.constant 0 : index
      %36 = vector.load %arg6[%c0_16, %c0_17] : memref<8x1xf32, #tpu.memory_space<vmem>>, vector<8x1xf32>
      %37 = vector.shape_cast %36 : vector<8x1xf32> to vector<1x8x1xf32>
      %cst_18 = arith.constant dense<0.000000e+00> : vector<1xf32>
      %38 = vector.multi_reduction <add>, %37, %cst_18 [1, 2] : vector<1x8x1xf32> to vector<1xf32>
      %39 = vector.shape_cast %38 : vector<1xf32> to vector<1x1x1xf32>
      %40 = vector.extract %39[0, 0, 0] : f32 from vector<1x1x1xf32>
      %cst_19 = arith.constant 5.000000e-02 : f32
      %41 = arith.mulf %40, %cst_19 : f32
      %c0_20 = arith.constant 0 : index
      %c0_21 = arith.constant 0 : index
      %42 = memref.load %arg5[%c0_20, %c0_21] : memref<1x1xf32, #tpu.memory_space<smem>>
      memref.store %41, %arg5[%c0_20, %c0_21] : memref<1x1xf32, #tpu.memory_space<smem>>
    } else {
    }
    return
  }
  func.func @transform_0(%arg0: i32) -> (i32, i32) {
    %c0_i32 = arith.constant 0 : i32
    %c0_i32_0 = arith.constant 0 : i32
    %c0_i32_1 = arith.constant 0 : i32
    return %c0_i32, %c0_i32_0 : i32, i32
  }
  func.func @transform_1(%arg0: i32) -> (i32, i32) {
    %c0_i32 = arith.constant 0 : i32
    %c0_i32_0 = arith.constant 0 : i32
    return %arg0, %c0_i32 : i32, i32
  }
  func.func @transform_2(%arg0: i32) -> (i32, i32) {
    %c0_i32 = arith.constant 0 : i32
    %c0_i32_0 = arith.constant 0 : i32
    return %arg0, %c0_i32 : i32, i32
  }
  func.func @transform_3(%arg0: i32) -> (i32, i32) {
    %c0_i32 = arith.constant 0 : i32
    %c0_i32_0 = arith.constant 0 : i32
    return %arg0, %c0_i32 : i32, i32
  }
  func.func @transform_4(%arg0: i32) -> (i32, i32) {
    %c0_i32 = arith.constant 0 : i32
    %c0_i32_0 = arith.constant 0 : i32
    %c0_i32_1 = arith.constant 0 : i32
    return %c0_i32, %c0_i32_0 : i32, i32
  }
}

</mosaic_0001>

<bundles_post_ra>
// kernel: tpu_custom_call.1
= control target key start
LH: loop header
LB: loop body
LE: loop exit
PB: predicated region body
PF: predicated region fallthrough
CT: control target
= control target key end

     0   :  { %s682_s0 = inlined_call_operand.<no memory space> [shape: f32[1,1], index: 0, kind: input, shape index: {}]   ;;  %s683_s1 = inlined_call_operand.vmem [shape: f32[20,32], index: 1, kind: input, shape index: {}]   ;;  %s684_s2 = inlined_call_operand.hbm [shape: f32[20,32], index: 2, kind: input, shape index: {}]   ;;  %s685_s3 = inlined_call_operand.vmem [shape: f32[20,1], index: 3, kind: input, shape index: {}]   ;;  %s686_s4 = inlined_call_operand.hbm [shape: f32[1,1], index: 4, kind: output, shape index: {}]  }
   0x1   :  { %9 = sst [smem:[#allocation3]] %s682_s0 }
   0x2   :  { %10 = vsyncpa [#allocation5], 0 }
   0x3   :  { %12 = vsyncpa [#allocation5 + $0x1], 0 }
   0x4   :  { %13 = vsyncpa [#allocation6], 0  ;;  %s556_s17 = smov 0   ;;  %s558_s18 = smov 0  }
   0x5   :  { %s560_s19 = smov 0   ;;  %s562_s20 = smov 0  }
   0x6 LB: > { %s575_s0 = sadd.s32 4294967295, %s523_s20   ;;  %s578_s21 = sadd.s32 1, %s523_s20   ;;  %s523_s20 = sphi %s562_s20, %s694_s20   ;;  %s519_s19 = sphi %s560_s19, %s693_s19   ;;  %s515_s18 = sphi %s558_s18, %s692_s18   ;;  %s511_s17 = sphi %s556_s17, %s691_s17  }
   0x7   : > { %s70_s22 = ssub.s32 %s523_s20, %s578_s21  ;;  %s73_s23 = sadd.s32 1, %s519_s19 }
   0x8   : > { %p71_p0 = scmp.eq.s32.totalorder %s70_s22, 0  ;;  %p80_p1 = scmp.ne.s32.totalorder %s519_s19, %s515_s18 }
   0x9   : > { %p81_p2 = scmp.eq.s32.totalorder %s523_s20, 0  ;;  %p86_p3 = scmp.ne.s32.totalorder %s515_s18, %s511_s17 }
   0xa   : > { %s588_s24 = scalar_select %p71_p0, %s519_s19, %s73_s23  }
   0xb   : > { %p82_p4 = por %p81_p2, %p80_p1  ;;  %p87_p5 = scmp.eq.s32.totalorder %s575_s0, 0 }
   0xc   : > { %p404_p6 = scmp.lt.s32.totalorder %s523_s20, 3  ;;  %s167_s26 = sand.u32 1, %s519_s19  }
   0xd   : > { %p592_p7 = por %p87_p5, %p86_p3  ;;  %s379_s27 = sshll.u32 %s167_s26, 3 }
   0xe   : > { %s380_s28 = sshll.u32 %s523_s20, 7  ;;  %s171_s6 = scalar_lea.vmem [#allocation4], %s379_s27 }
   0xf   : > { %s601_s5 = scalar_lea.hbm %s684_s2, %s380_s28  ;;  %s178_s7 = sshll.u32 %s171_s6, 4  ;;  %s603_s7 = int_to_ptr.vmem [resolvable:$true] %s178_s7 }
  0x10   : > { %p605_p8 = pnand %p404_p6, %p82_p4  ;;  %s168_s9 = scalar_lea.sflag [#allocation5], %s167_s26 }
  0x11   : > { %s443_s10 = scalar_lea.hbm %s601_s5, 128  ;;  %s448_s13 = scalar_lea.hbm %s684_s2, 384 }
  0x12   : > { %p444_p11 = scmp.ne.s32.totalorder %s601_s5, %s443_s10  ;;  %p445_p12 = pneg %p605_p8 }
  0x13   : > { %p449_p1 = scmp.lt.u32.totalorder %s601_s5, %s684_s2  ;;  %p450_p2 = scmp.lt.u32.totalorder %s448_s13, %s443_s10 }
  0x14   : > { %p446_p13 = pnand %p445_p12, %p444_p11  ;;  %p452_p4 = scmp.lt.u32.totalorder %s443_s10, %s601_s5 }
  0x15   : > { %p451_p3 = por %p450_p2, %p449_p1 }
  0x16   : > { %p447_p0 = pneg %p446_p13 }
  0x17   : > { %p453_p5 = por %p452_p4, %p451_p3 }
  0x19   : > { %p454_p6 = pnand %p453_p5, %p447_p0 }
  0x1b   : > { %457 = shalt.err (!%p454_p6)
}
  0x1c   : > { %s458_s16 = scalar_lea.vmem %s603_s7, 128  ;;  %s525_s17 = smov [#allocation4]  }
  0x1d   : > { %p459_p11 = scmp.ne.s32.totalorder %s603_s7, %s458_s16  ;;  %s463_s22 = sshll.u32 %s525_s17, 4  ;;  %s464_s22 = int_to_ptr.vmem [resolvable:$false] %s463_s22 }
  0x1e   : > { %s465_s23 = scalar_lea.vmem %s464_s22, 256  ;;  %p466_p10 = scmp.lt.s32.totalorder %s603_s7, %s464_s22 }
  0x1f   : > { %p461_p13 = pnand %p459_p11, %p445_p12  ;;  %p467_p1 = scmp.lt.s32.totalorder %s465_s23, %s458_s16 }
  0x21   : > { %p462_p9 = pneg %p461_p13  ;;  %p468_p2 = por %p467_p1, %p466_p10 }
  0x23   : > { %p469_p3 = pnand %p468_p2, %p462_p9 }
  0x25   : > { %472 = shalt.err (!%p469_p3)
}
  0x26   : > { %403 = dma.hbm_to_vmem [thread:$0]  (!%p605_p8), %s601_s5, 128, %s603_s7, %s168_s9  }
  0x27   : > { %p689_p0 = scmp.lt.s32.totalorder %s523_s20, 4  ;;  %p690_p4 = scmp.ge.s32.totalorder %s523_s20, 1 }
  0x29   : > { %p191_p12 = pnand %p690_p4, %p689_p0 }
  0x2a   : > { %s196_s26 = sand.u32 (!%p191_p12), 1, %s515_s18  }
  0x2b   : > { %194 = sbr.rel (%p191_p12) target bundleno = 468 (0x1d4), region = 36  ;;  %s382_s27 = sshll.u32 (!%p191_p12), %s196_s26, 3 }
  0x2c   : > { %s197_s28 = scalar_lea.sflag (!%p191_p12), [#allocation5], %s196_s26  ;;  %s200_s29 = scalar_lea.vmem (!%p191_p12), [#allocation4], %s382_s27 }
  0x32   : > { %502 = dma.done.wait (%p592_p7), %s197_s28, 128  }
  0x33   : > { %504 = vsyncadd (%p592_p7), %s197_s28, 4294967168  ;;  %p228_p9 = scmp.lt.s32.totalorder %s575_s0, 2  ;;  %p385_p8 = scmp.ne.s32.totalorder %s575_s0, 0 }
  0x34   : > { %vm240_vm0 = vcmask (!%p385_p8), 7168   ;;  %v526_v0 = vmov (!%p385_p8), 0.0  }
  0x35   : > { %s229_s30 = scalar_select %p228_p9, %s575_s0, 2 }
  0x36   : > { %239 = sbr.rel (%p385_p8) target bundleno = 61 (0x3d), region = 44  ;;  %241 = vst.msk [vmem:[#allocation2] sm:$0xff] (!%p385_p8), %vm240_vm0, %v526_v0 }
  0x37   : > { %s383_s5 = sshll.u32 %s229_s30, 3 }
  0x38   : > { %s231_s7 = scalar_lea.vmem %s683_s1, %s383_s5  ;;  %s235_s10 = scalar_lea.vmem %s685_s3, %s383_s5 }
  0x3d PF: > { %v242_v1 = vld [vmem:[%s231_s7] sm:$0xff]  ;;  %v243_v2 = vld [vmem:[%s200_s29] sm:$0xff]  ;;  %vm246_vm1 = vcmask 261120   ;;  %s258_s25 = sld [smem:[#allocation3]]  ;;  %v267_v8 = vlaneseq  ;;  %s386_s11 = sshll.u32 %s575_s0, 3  ;;  %vm276_vm5 = vcmask 7168  }
  0x3e   : > { %v244_v3 = vsub.f32 %v242_v1, %v243_v2  ;;  %v257_v14 = vld [vmem:[%s235_s10] sm:$0xff]  ;;  %v270_v18 = vstv %s386_s11  ;;  %p387_p7 = scmp.ne.s32.totalorder %s575_s0, 2 }
  0x3f   : > { %v268_v15 = vshrl.u32 %v267_v8, 7  ;;  %v263_v17 = vsub.f32 1.0, %v257_v14  ;;  %v274_v25 = vld [vmem:[#allocation2] sm:$0xff] }
  0x40   : > { %v245_v4 = vmul.f32 %v244_v3, %v244_v3 }
  0x41   : > { %v271_v20 = vadd.s32 %v270_v18, %v268_v15 }
  0x42   : > { %v247_v5 = vsel %vm246_vm1, %v245_v4, 0.0 }
  0x43   : > { %248 = vadd.xlane.f32.xlu0 %v247_v5  ;;  %v259_v11 = vstv %s258_s25  ;;  %vm272_vm4 = vcmp.lt.s32.totalorder %v271_v20, 20 }
  0xd0   : > { %v249_v6 = vpop.xlane.xlu0 %248 }
  0xd1   : > { %441 = vrsqrt.f32 %v249_v6  ;;  %vm252_vm2 = vcmp.eq.f32.partialorder %v249_v6, inf  ;;  %v255_v10 = vand.u32 2147483648, %v249_v6  ;;  %vm254_vm3 = vcmp.eq.f32.partialorder %v249_v6, 0.0 }
  0xd2   : > { %v262_v22 = vmul.f32 %v257_v14, %v249_v6 }
  0xdb   : > { %v442_v7 = vpop.eup %441 }
  0xdc   : > { %v251_v9 = vmul.f32 %v442_v7, %v249_v6 }
  0xde   : > { %v253_v12 = vsel %vm252_vm2, %v249_v6, %v251_v9 }
  0xdf   : > { %v256_v13 = vsel %vm254_vm3, %v255_v10, %v253_v12 }
  0xe0   : > { %v260_v16 = vsub.f32 %v259_v11, %v256_v13 }
  0xe2   : > { %v261_v19 = vmax.f32 %v260_v16, 0.0 }
  0xe4   : > { %v264_v21 = vmul.f32 %v263_v17, %v261_v19 }
  0xe6   : > { %v265_v23 = vmul.f32 %v264_v21, %v261_v19 }
  0xe7   : > { %281 = sbr.rel (%p387_p7) target bundleno = 453 (0x1c5), region = 48 }
  0xe8   : > { %v266_v24 = vadd.f32 %v265_v23, %v262_v22 }
  0xea   : > { %v273_v26 = vsel %vm272_vm4, %v266_v24, 0.0 }
  0xeb   : > { %v275_v27 = vadd.f32 %v274_v25, %v273_v26 }
  0xed   : > { %277 = vst.msk [vmem:[#allocation2] sm:$0xff] %vm276_vm5, %v275_v27 }
  0xf4   : > { %v282_v28 = vld [vmem:[#allocation2] sm:$0xff] }
  0xf5   : > { %v283_v29 = vsel %vm276_vm5, %v282_v28, 0.0 }
  0xf6   : > { %284 = vadd.xlane.f32.xlu0 %v283_v29 }
 0x183   : > { %v285_v30 = vpop.xlane.xlu0 %284 }
 0x184   : > { %v286_v31 = vrot.slane %v285_v30, 4 }
 0x186   : > { %v287_v32 = vadd.f32 %v286_v31, %v285_v30 }
 0x188   : > { %v288_v33 = vrot.slane %v287_v32, 2 }
 0x18a   : > { %v289_v34 = vadd.f32 %v288_v33, %v287_v32 }
 0x18c   : > { %v290_v35 = vrot.slane %v289_v34, 1 }
 0x18e   : > { %v291_v36 = vadd.f32 %v290_v35, %v289_v34 }
 0x190   : > { %392 = vpush %v291_v36 }
 0x1c1   : > { %s393_s12 = spop %392 }
 0x1c2   : > { %s293_s13 = smul.f32 0.05, %s393_s12 }
 0x1c4   : > { %295 = sst [smem:[#allocation7]] %s293_s13 }
 0x1c5 PF: > { %p405_p10 = scmp.eq.s32.totalorder %s575_s0, 2  ;;  %s473_s16 = scalar_lea.hbm %s686_s4, 16 }
 0x1c6   : > { %p474_p5 = scmp.ne.s32.totalorder %s686_s4, %s473_s16  ;;  %p479_p13 = scmp.lt.u32.totalorder %s473_s16, %s686_s4 }
 0x1c8   : > { %p475_p6 = pnand %p474_p5, %p405_p10 }
 0x1ca   : > { %p476_p11 = pneg %p475_p6 }
 0x1cc   : > { %p481_p1 = pnand %p479_p13, %p476_p11 }
 0x1ce   : > { %484 = shalt.err (!%p481_p1)
}
 0x1cf   : > { %s527_s27 = smov [#allocation7]  }
 0x1d0   : > { %397 = dma.smem_to_hbm (%p405_p10), %s527_s27, 16, %s686_s4, [#allocation6]  }
 0x1d1   : > { %506 = dma.done.wait (%p405_p10), [#allocation6], 16  }
 0x1d2   : > { %508 = vsyncadd (%p405_p10), [#allocation6], 4294967280 }
 0x1d3   : > { %309 = sfence }
 0x1d4 PF: > { %p16_p2 = scmp.ge.s32.totalorder %s578_s21, 5   ;;  %s691_s17 = smov %s515_s18 }
 0x1d5   : > { %s692_s18 = smov %s519_s19  ;;  %s693_s19 = smov %s588_s24 }
 0x1d6   : > { %s694_s20 = smov %s578_s21  ;;  %18 = sbr.rel (!%p16_p2) target bundleno = 6 (0x6), region = 88 }
 0x1dd   :  { %315 = vsyncpa [#allocation5], 1 }
 0x1de   :  { %317 = vsyncpa [#allocation5 + $0x1], 1 }
 0x1df   :  { %318 = vsyncpa [#allocation6], 1 }
 0x1e0   :  { %320 = vsyncpa [#allocation6 + $0x1], 1 }

</bundles_post_ra>
